<compile_context>
chip_gen: v5e
topology: v5e:2x2
jax: 0.10.0
libtpu: 0.0.40
codegen_flags: <defaults>
</compile_context>

<pallas_src>
from functools import partial

import numpy as np
import jax
import jax.numpy as jnp
from jax import lax
from jax.experimental import pallas as pl
from jax.experimental.pallas import tpu as pltpu

OUTPUT_SIZES = (2, 3, 6)
SAMPLE_DIM = sum(s * s for s in OUTPUT_SIZES)  # 49

_MAX_BATCH_TILE = 8          # bounds in-kernel unrolling over batch


# ---------------------------------------------------------------------------
# trace-time helpers
# ---------------------------------------------------------------------------
def _adaptive_pool_regions(in_size, out_size):
    # Same arithmetic as torch.nn.AdaptiveMaxPool2d (regions may overlap).
    regions = []
    for i in range(out_size):
        start = (i * in_size) // out_size
        end = -(-((i + 1) * in_size) // out_size)  # ceil
        regions.append((start, end))
    return regions


def _pool_geometry(h, w):
    """(window sizes per level, one-hot selection matrix).

    windows: ((len_h, len_w), ...) for output sizes (2, 3, 6).
    selection: (3*h*w, SAMPLE_DIM) f32; row (level*h*w + anchor_flat) is the
    one-hot source lane of SPP output column j (columns ordered level2 cells
    row-major, then level3, then level6 -- matching torch's flatten/cat order).
    """
    hw = h * w
    sel = np.zeros((len(OUTPUT_SIZES) * hw, SAMPLE_DIM), np.float32)
    wins = []
    col = 0
    for li, o in enumerate(OUTPUT_SIZES):
        hr = _adaptive_pool_regions(h, o)
        wr = _adaptive_pool_regions(w, o)
        lh = {e - s for (s, e) in hr}
        lw = {e - s for (s, e) in wr}
        assert len(lh) == 1 and len(lw) == 1, "non-uniform adaptive pool window"
        wins.append((lh.pop(), lw.pop()))
        for (hs, _he) in hr:
            for (ws, _we) in wr:
                sel[li * hw + hs * w + ws, col] = 1.0
                col += 1
    assert col == SAMPLE_DIM
    return tuple(wins), jnp.asarray(sel)


def _round_up(v, m):
    return -(-v // m) * m


def _padded_bytes(shape, dtype):
    """VMEM footprint of a 2-D tile (lane dim padded to 128, sublane to 8)."""
    s = list(shape)
    s[-1] = _round_up(s[-1], 128)
    if len(s) >= 2:
        s[-2] = _round_up(s[-2], 8)
    return int(np.prod(s)) * jnp.dtype(dtype).itemsize


def _default_vmem_limit():
    cap = None
    try:
        cap = int(getattr(pltpu.get_tpu_info(), "vmem_capacity_bytes", 0)) or None
    except Exception:
        cap = None
    if cap is None:
        cap = 64 << 20                      # conservative (v7x-sized) fallback
    return int(max(32 << 20, min(96 << 20, (cap * 3) // 4)))


def _pick_batch_tile(b, per_batch_bytes, budget):
    """Batch-tile size: VMEM-budgeted, capped, and leaving >= 2 grid steps."""
    cap = min(b, _MAX_BATCH_TILE)
    if b >= 2:
        cap = min(cap, b // 2)   # keep grid >= 2 so both v7x TensorCores run
    cap = max(cap, 1)
    fit = max(1, budget // max(int(per_batch_bytes), 1))
    return max(1, min(cap, fit))


def _pad_batch(a, b_pad):
    b = a.shape[0]
    if b_pad == b:
        return a
    cfg = [(0, b_pad - b)] + [(0, 0)] * (a.ndim - 1)
    return jnp.pad(a, cfg)


def _cat(parts, axis):
    return parts[0] if len(parts) == 1 else jnp.concatenate(parts, axis=axis)


# ---------------------------------------------------------------------------
# kernel 1: fused conv_theta / conv_g (1x1) + spatial-pyramid adaptive max pool
# ---------------------------------------------------------------------------
def _pool_kernel(x_ref, w_ref, sel_ref, o_ref, *, bt, hw, row_w, wins,
                 compute_dtype):
    cd = compute_dtype
    wtg = w_ref[...].astype(cd)                                     # (K, c)
    # one lane-dense matmul for theta+g over all bt batch elements
    xcat = _cat([x_ref[n].astype(cd) for n in range(bt)], axis=1)   # (c, bt*hw)
    tg = jnp.dot(wtg, xcat, preferred_element_type=jnp.float32)     # (K, bt*hw)
    rows = tg.shape[0]

    def shift(a, k):
        # y[:, s] = a[:, s+k]; tail filled with a large negative (max-neutral).
        if k <= 0:
            return a
        pad = jnp.full((rows, k), -1e30, dtype=a.dtype)
        return jnp.concatenate([a[:, k:], pad], axis=1)

    def window_max(a, length, stride):
        r = a
        for d in range(1, length):
            r = jnp.maximum(r, shift(a, d * stride))
        return r

    # separable window maxes: w-direction (stride 1) then h-direction (stride w)
    fmaps = []
    for (lh, lw) in wins:
        fmaps.append(window_max(window_max(tg, lw, 1), lh, row_w))  # (K, bt*hw)

    sel = sel_ref[...]                                              # (3*hw, 49)
    for n in range(bt):
        lo = n * hw
        fn = _cat([fm[:, lo:lo + hw] for fm in fmaps], axis=1)      # (K, 3*hw)
        # one-hot gather of the 49 pyramid-cell anchors (tiny MXU matmul)
        o_ref[n] = jnp.dot(fn, sel, preferred_element_type=jnp.float32)


# ---------------------------------------------------------------------------
# kernel 2: conv_phi + non-local attention + conv_mask + residual
# ---------------------------------------------------------------------------
def _attn_kernel(x_ref, th_ref, g_ref, wp_ref, wm_ref, o_ref, *, bt, hw,
                 compute_dtype):
    cd = compute_dtype
    wp = wp_ref[...].astype(cd)                                     # (c2, c)
    wm = wm_ref[...].astype(cd)                                     # (c2, c) = conv_mask^T

    # conv_phi batched over the block: (c2, c) @ (c, bt*hw)
    xcat = _cat([x_ref[n].astype(cd) for n in range(bt)], axis=1)   # (c, bt*hw)
    phi = jnp.dot(wp, xcat, preferred_element_type=jnp.float32)     # (c2, bt*hw)

    # conv_mask re-associated onto g, batched: (bt*49, c2) @ (c2, c)
    g_all = _cat([g_ref[n].astype(cd) for n in range(bt)], axis=0)  # (bt*49, c2)
    gm_all = jnp.dot(g_all, wm, preferred_element_type=jnp.float32)  # (bt*49, c)

    for n in range(bt):
        phin = phi[:, n * hw:(n + 1) * hw].astype(cd)               # (c2, hw)
        # theta @ phi : (49, c2) @ (c2, hw)
        sc = jnp.dot(th_ref[n].astype(cd), phin,
                     preferred_element_type=jnp.float32)            # (49, hw) [i, s]
        # torch softmax(dim=1) on (b, 49, hw) == softmax over rows (axis 0)
        sc = sc - jnp.max(sc, axis=0, keepdims=True)
        e = jnp.exp(sc)
        p = e * pl.reciprocal(jnp.sum(e, axis=0, keepdims=True), approx=True)

        gm = gm_all[n * SAMPLE_DIM:(n + 1) * SAMPLE_DIM, :]         # (49, c)
        # out[o, t] = x[o, t] + sum_s gm[s, o] * p[t, s]
        #  -> contract gm axis 0 with p axis 1 (p's row index is the output
        #     spatial index).  This is the corrected contraction.
        add = lax.dot_general(gm.astype(cd), p.astype(cd),
                              (((0,), (1,)), ((), ())),
                              preferred_element_type=jnp.float32)   # (c, 49)
        o_ref[n] = x_ref[n] + add                                   # f32 residual


# ---------------------------------------------------------------------------
# torch's SPP flatten / cat / view(b, 49, -1) glue (mixes batch & channel)
# ---------------------------------------------------------------------------
def _torch_spp_view(p, b, c2):
    segs, off = [], 0
    for s_ in OUTPUT_SIZES:
        n = s_ * s_
        segs.append(p[:, :, off:off + n].reshape(-1))
        off += n
    return jnp.concatenate(segs, axis=0).reshape(b, SAMPLE_DIM, c2)


# ---------------------------------------------------------------------------
# full forward
# ---------------------------------------------------------------------------
def afnb_forward(x, w_phi, w_theta, w_g, w_mask, *, compute_dtype=jnp.float32):
    b, c, h, w = x.shape
    c2 = c // 2
    hw = h * w
    K = 2 * c2
    assert hw == SAMPLE_DIM, "AFNB requires h*w == 49 (e.g. 7x7 feature maps)"

    x3 = x.reshape(b, c, hw).astype(jnp.float32)            # NCHW, spatial flat
    wins, sel = _pool_geometry(h, w)

    op_dt = compute_dtype                                    # MXU operand dtype
    w_tg = jnp.concatenate([w_theta, w_g], axis=0).astype(op_dt)   # (K, c)
    w_phi_k = w_phi.astype(op_dt)                            # (c2, c)
    w_mask_t = w_mask.T.astype(op_dt)                        # (c2, c)

    vmem_limit = _default_vmem_limit()
    budget = vmem_limit // 3
    cparams = pltpu.CompilerParams(dimension_semantics=("parallel",),
                                   vmem_limit_bytes=vmem_limit)

    # ---- kernel 1: conv_theta/conv_g + SPP max pool ------------------------
    pb1 = (2 * _padded_bytes((c, hw), jnp.float32)           # x block (2x buf)
           + 2 * _padded_bytes((K, SAMPLE_DIM), jnp.float32)  # pooled block
           + _padded_bytes((c, hw), op_dt)                   # xcat
           + 6 * _padded_bytes((K, hw), jnp.float32))        # tg + level maps
    bt1 = _pick_batch_tile(b, pb1, budget)
    b1 = _round_up(b, bt1)
    pooled = pl.pallas_call(
        partial(_pool_kernel, bt=bt1, hw=hw, row_w=w, wins=wins,
                compute_dtype=op_dt),
        out_shape=jax.ShapeDtypeStruct((b1, K, SAMPLE_DIM), jnp.float32),
        grid=(b1 // bt1,),
        in_specs=[pl.BlockSpec((bt1, c, hw), lambda i: (i, 0, 0)),
                  pl.BlockSpec((K, c), lambda i: (0, 0)),
                  pl.BlockSpec((len(OUTPUT_SIZES) * hw, SAMPLE_DIM),
                               lambda i: (0, 0))],
        out_specs=pl.BlockSpec((bt1, K, SAMPLE_DIM), lambda i: (i, 0, 0)),
        compiler_params=cparams,
    )(_pad_batch(x3, b1), w_tg, sel)
    pooled = pooled[:b]

    # torch's cross-batch flatten/cat/view -- tiny (b * 2*c2 * 49 elements)
    x_theta = _torch_spp_view(pooled[:, :c2, :], b, c2).astype(op_dt)
    x_g = _torch_spp_view(pooled[:, c2:, :], b, c2).astype(op_dt)

    # ---- kernel 2: conv_phi + attention + conv_mask + residual -------------
    pb2 = (4 * _padded_bytes((c, hw), jnp.float32)           # x in + out (2x buf)
           + 4 * _padded_bytes((SAMPLE_DIM, c2), op_dt)      # theta + g blocks
           + _padded_bytes((c, hw), op_dt)                   # xcat
           + _padded_bytes((c2, hw), jnp.float32)            # phi
           + _padded_bytes((SAMPLE_DIM, c), jnp.float32)     # gm rows
           + 3 * _padded_bytes((SAMPLE_DIM, hw), jnp.float32)  # sc / e / p
           + _padded_bytes((c, hw), jnp.float32))            # add
    bt2 = _pick_batch_tile(b, pb2, budget)
    b2 = _round_up(b, bt2)
    out3 = pl.pallas_call(
        partial(_attn_kernel, bt=bt2, hw=hw, compute_dtype=op_dt),
        out_shape=jax.ShapeDtypeStruct((b2, c, hw), jnp.float32),
        grid=(b2 // bt2,),
        in_specs=[pl.BlockSpec((bt2, c, hw), lambda i: (i, 0, 0)),
                  pl.BlockSpec((bt2, SAMPLE_DIM, c2), lambda i: (i, 0, 0)),
                  pl.BlockSpec((bt2, SAMPLE_DIM, c2), lambda i: (i, 0, 0)),
                  pl.BlockSpec((c2, c), lambda i: (0, 0)),
                  pl.BlockSpec((c2, c), lambda i: (0, 0))],
        out_specs=pl.BlockSpec((bt2, c, hw), lambda i: (i, 0, 0)),
        input_output_aliases={0: 0},        # residual x buffer reused for output
        compiler_params=cparams,
    )(_pad_batch(x3, b2), _pad_batch(x_theta, b2), _pad_batch(x_g, b2),
      w_phi_k, w_mask_t)

    return out3[:b].reshape(b, c, h, w)                      # NCHW


# ---------------------------------------------------------------------------
# pure-JAX reference (mirrors the PyTorch forward) for the correctness check
# ---------------------------------------------------------------------------
def afnb_reference(x, w_phi, w_theta, w_g, w_mask):
    b, c, h, w = x.shape
    c2 = c // 2

    def conv1x1_nchw(xx, W):
        return jnp.einsum('oc,bchw->bohw', W, xx)

    def spp(xx):
        outs = []
        for s_ in OUTPUT_SIZES:
            hr = _adaptive_pool_regions(h, s_)
            wr = _adaptive_pool_regions(w, s_)
            rows = []
            for (hs, he) in hr:
                cols = [jnp.max(xx[:, :, hs:he, ws:we], axis=(2, 3))
                        for (ws, we) in wr]
                rows.append(jnp.stack(cols, axis=-1))
            pooled = jnp.stack(rows, axis=-2)             # (b, c2, s, s)
            outs.append(pooled.reshape(-1))
        return jnp.concatenate(outs, axis=0)

    x_phi = conv1x1_nchw(x, w_phi).reshape(b, c2, -1)
    x_theta = spp(conv1x1_nchw(x, w_theta)).reshape(b, SAMPLE_DIM, -1)
    x_g = spp(conv1x1_nchw(x, w_g)).reshape(b, SAMPLE_DIM, -1)
    mul = jnp.einsum('bij,bjk->bik', x_theta, x_phi)
    mul = jax.nn.softmax(mul, axis=1)
    y = jnp.einsum('bij,bjk->bik', mul, x_g)
    y = jnp.transpose(y, (0, 2, 1)).reshape(b, c2, h, w)
    mask = jnp.einsum('oc,bchw->bohw', w_mask, y)
    return mask + x


# ---------------------------------------------------------------------------
if __name__ == "__main__":
    b, channel, h, w = 2, 4, 7, 7          # h*w must equal sample_dim = 49
    c2 = channel // 2

    key = jax.random.PRNGKey(0)
    k1, k2, k3, k4, kx = jax.random.split(key, 5)
    w_phi = 0.1 * jax.random.normal(k1, (c2, channel), jnp.float32)
    w_theta = 0.1 * jax.random.normal(k2, (c2, channel), jnp.float32)
    w_g = 0.1 * jax.random.normal(k3, (c2, channel), jnp.float32)
    w_mask = 0.1 * jax.random.normal(k4, (channel, c2), jnp.float32)
    x = jax.random.normal(kx, (b, channel, h, w), jnp.float32)

    ref = jax.block_until_ready(afnb_reference(x, w_phi, w_theta, w_g, w_mask))

    # f32 path (tolerance covers MXU default matmul precision + approx recip)
    out = jax.block_until_ready(
        jax.jit(afnb_forward)(x, w_phi, w_theta, w_g, w_mask))
    np.testing.assert_allclose(np.asarray(out), np.asarray(ref),
                               rtol=2e-2, atol=5e-3)

    # bf16-operand path (production setting: bf16 MXU operands, f32 accum)
    out_bf16 = jax.block_until_ready(
        jax.jit(partial(afnb_forward, compute_dtype=jnp.bfloat16))(
            x, w_phi, w_theta, w_g, w_mask))
    np.testing.assert_allclose(np.asarray(out_bf16), np.asarray(ref),
                               rtol=5e-2, atol=3e-2)

    print("KERNEL_OK")
</pallas_src>

<mosaic_0001>
module attributes {stable_mosaic.version = 11 : i64} {
  func.func @_pool_kernel(%arg0: i32, %arg1: memref<1x4x49xf32, #tpu.memory_space<vmem>>, %arg2: memref<4x4xf32, #tpu.memory_space<vmem>>, %arg3: memref<147x49xf32, #tpu.memory_space<vmem>>, %arg4: memref<1x4x49xf32, #tpu.memory_space<vmem>>) attributes {dimension_semantics = [#tpu.dimension_semantics<parallel>], iteration_bounds = array<i64: 2>, scalar_prefetch = 0 : i64, scratch_operands = 0 : i64, tpu.core_type = #tpu.core_type<tc>, window_params = [{transform_indices = @transform_0, window_bounds = array<i64: 1, 4, 49>}, {pipeline_mode = #tpu.pipeline_mode<synchronous>, transform_indices = @transform_1, window_bounds = array<i64: 4, 4>}, {pipeline_mode = #tpu.pipeline_mode<synchronous>, transform_indices = @transform_2, window_bounds = array<i64: 147, 49>}, {transform_indices = @transform_3, window_bounds = array<i64: 1, 4, 49>}]} {
    %c0 = arith.constant 0 : index
    %c0_0 = arith.constant 0 : index
    %0 = vector.load %arg2[%c0, %c0_0] : memref<4x4xf32, #tpu.memory_space<vmem>>, vector<4x4xf32>
    %c0_1 = arith.constant 0 : index
    %c0_2 = arith.constant 0 : index
    %c0_3 = arith.constant 0 : index
    %1 = vector.load %arg1[%c0_1, %c0_2, %c0_3] : memref<1x4x49xf32, #tpu.memory_space<vmem>>, vector<1x4x49xf32>
    %2 = vector.shape_cast %1 : vector<1x4x49xf32> to vector<4x49xf32>
    %cst = arith.constant dense<0.000000e+00> : vector<4x49xf32>
    %3 = tpu.matmul %0, %2, %cst {dimension_numbers = #tpu.dot_dimension_numbers<[1], [0], [0], [1], [0, 0, 1, 1], [], []>} : vector<4x4xf32>, vector<4x49xf32>, vector<4x49xf32> -> vector<4x49xf32>
    %cst_4 = arith.constant -1.000000e+30 : f32
    %4 = vector.broadcast %cst_4 : f32 to vector<4x1xf32>
    %5 = vector.extract_strided_slice %3 {offsets = [0, 1], sizes = [4, 48], strides = [1, 1]} : vector<4x49xf32> to vector<4x48xf32>
    %6 = tpu.concatenate %5, %4 in 1 : vector<4x48xf32>, vector<4x1xf32> -> vector<4x49xf32>
    %7 = arith.maximumf %3, %6 : vector<4x49xf32>
    %cst_5 = arith.constant -1.000000e+30 : f32
    %8 = vector.broadcast %cst_5 : f32 to vector<4x2xf32>
    %9 = vector.extract_strided_slice %3 {offsets = [0, 2], sizes = [4, 47], strides = [1, 1]} : vector<4x49xf32> to vector<4x47xf32>
    %10 = tpu.concatenate %9, %8 in 1 : vector<4x47xf32>, vector<4x2xf32> -> vector<4x49xf32>
    %11 = arith.maximumf %7, %10 : vector<4x49xf32>
    %cst_6 = arith.constant -1.000000e+30 : f32
    %12 = vector.broadcast %cst_6 : f32 to vector<4x3xf32>
    %13 = vector.extract_strided_slice %3 {offsets = [0, 3], sizes = [4, 46], strides = [1, 1]} : vector<4x49xf32> to vector<4x46xf32>
    %14 = tpu.concatenate %13, %12 in 1 : vector<4x46xf32>, vector<4x3xf32> -> vector<4x49xf32>
    %15 = arith.maximumf %11, %14 : vector<4x49xf32>
    %cst_7 = arith.constant -1.000000e+30 : f32
    %16 = vector.broadcast %cst_7 : f32 to vector<4x7xf32>
    %17 = vector.extract_strided_slice %15 {offsets = [0, 7], sizes = [4, 42], strides = [1, 1]} : vector<4x49xf32> to vector<4x42xf32>
    %18 = tpu.concatenate %17, %16 in 1 : vector<4x42xf32>, vector<4x7xf32> -> vector<4x49xf32>
    %19 = arith.maximumf %15, %18 : vector<4x49xf32>
    %cst_8 = arith.constant -1.000000e+30 : f32
    %20 = vector.broadcast %cst_8 : f32 to vector<4x14xf32>
    %21 = vector.extract_strided_slice %15 {offsets = [0, 14], sizes = [4, 35], strides = [1, 1]} : vector<4x49xf32> to vector<4x35xf32>
    %22 = tpu.concatenate %21, %20 in 1 : vector<4x35xf32>, vector<4x14xf32> -> vector<4x49xf32>
    %23 = arith.maximumf %19, %22 : vector<4x49xf32>
    %cst_9 = arith.constant -1.000000e+30 : f32
    %24 = vector.broadcast %cst_9 : f32 to vector<4x21xf32>
    %25 = vector.extract_strided_slice %15 {offsets = [0, 21], sizes = [4, 28], strides = [1, 1]} : vector<4x49xf32> to vector<4x28xf32>
    %26 = tpu.concatenate %25, %24 in 1 : vector<4x28xf32>, vector<4x21xf32> -> vector<4x49xf32>
    %27 = arith.maximumf %23, %26 : vector<4x49xf32>
    %cst_10 = arith.constant -1.000000e+30 : f32
    %28 = vector.broadcast %cst_10 : f32 to vector<4x1xf32>
    %29 = vector.extract_strided_slice %3 {offsets = [0, 1], sizes = [4, 48], strides = [1, 1]} : vector<4x49xf32> to vector<4x48xf32>
    %30 = tpu.concatenate %29, %28 in 1 : vector<4x48xf32>, vector<4x1xf32> -> vector<4x49xf32>
    %31 = arith.maximumf %3, %30 : vector<4x49xf32>
    %cst_11 = arith.constant -1.000000e+30 : f32
    %32 = vector.broadcast %cst_11 : f32 to vector<4x2xf32>
    %33 = vector.extract_strided_slice %3 {offsets = [0, 2], sizes = [4, 47], strides = [1, 1]} : vector<4x49xf32> to vector<4x47xf32>
    %34 = tpu.concatenate %33, %32 in 1 : vector<4x47xf32>, vector<4x2xf32> -> vector<4x49xf32>
    %35 = arith.maximumf %31, %34 : vector<4x49xf32>
    %cst_12 = arith.constant -1.000000e+30 : f32
    %36 = vector.broadcast %cst_12 : f32 to vector<4x7xf32>
    %37 = vector.extract_strided_slice %35 {offsets = [0, 7], sizes = [4, 42], strides = [1, 1]} : vector<4x49xf32> to vector<4x42xf32>
    %38 = tpu.concatenate %37, %36 in 1 : vector<4x42xf32>, vector<4x7xf32> -> vector<4x49xf32>
    %39 = arith.maximumf %35, %38 : vector<4x49xf32>
    %cst_13 = arith.constant -1.000000e+30 : f32
    %40 = vector.broadcast %cst_13 : f32 to vector<4x14xf32>
    %41 = vector.extract_strided_slice %35 {offsets = [0, 14], sizes = [4, 35], strides = [1, 1]} : vector<4x49xf32> to vector<4x35xf32>
    %42 = tpu.concatenate %41, %40 in 1 : vector<4x35xf32>, vector<4x14xf32> -> vector<4x49xf32>
    %43 = arith.maximumf %39, %42 : vector<4x49xf32>
    %cst_14 = arith.constant -1.000000e+30 : f32
    %44 = vector.broadcast %cst_14 : f32 to vector<4x1xf32>
    %45 = vector.extract_strided_slice %3 {offsets = [0, 1], sizes = [4, 48], strides = [1, 1]} : vector<4x49xf32> to vector<4x48xf32>
    %46 = tpu.concatenate %45, %44 in 1 : vector<4x48xf32>, vector<4x1xf32> -> vector<4x49xf32>
    %47 = arith.maximumf %3, %46 : vector<4x49xf32>
    %cst_15 = arith.constant -1.000000e+30 : f32
    %48 = vector.broadcast %cst_15 : f32 to vector<4x7xf32>
    %49 = vector.extract_strided_slice %47 {offsets = [0, 7], sizes = [4, 42], strides = [1, 1]} : vector<4x49xf32> to vector<4x42xf32>
    %50 = tpu.concatenate %49, %48 in 1 : vector<4x42xf32>, vector<4x7xf32> -> vector<4x49xf32>
    %51 = arith.maximumf %47, %50 : vector<4x49xf32>
    %c0_16 = arith.constant 0 : index
    %c0_17 = arith.constant 0 : index
    %52 = vector.load %arg3[%c0_16, %c0_17] : memref<147x49xf32, #tpu.memory_space<vmem>>, vector<147x49xf32>
    %53 = tpu.concatenate %27, %43, %51 in 1 : vector<4x49xf32>, vector<4x49xf32>, vector<4x49xf32> -> vector<4x147xf32>
    %cst_18 = arith.constant dense<0.000000e+00> : vector<4x49xf32>
    %54 = tpu.matmul %53, %52, %cst_18 {dimension_numbers = #tpu.dot_dimension_numbers<[1], [0], [0], [1], [0, 0, 1, 1], [], []>} : vector<4x147xf32>, vector<147x49xf32>, vector<4x49xf32> -> vector<4x49xf32>
    %c0_19 = arith.constant 0 : index
    %c0_20 = arith.constant 0 : index
    %c0_21 = arith.constant 0 : index
    %55 = vector.load %arg4[%c0_19, %c0_20, %c0_21] : memref<1x4x49xf32, #tpu.memory_space<vmem>>, vector<1x4x49xf32>
    %56 = vector.shape_cast %55 : vector<1x4x49xf32> to vector<4x49xf32>
    %57 = vector.shape_cast %54 : vector<4x49xf32> to vector<1x4x49xf32>
    tpu.vector_store %arg4[%c0_19, %c0_20, %c0_21], %57 {strides = array<i32>} : memref<1x4x49xf32, #tpu.memory_space<vmem>>, vector<1x4x49xf32>,
    return
  }
  func.func @transform_0(%arg0: i32) -> (i32, i32, i32) {
    %c0_i32 = arith.constant 0 : i32
    %c0_i32_0 = arith.constant 0 : i32
    %c0_i32_1 = arith.constant 0 : i32
    return %arg0, %c0_i32, %c0_i32_0 : i32, i32, i32
  }
  func.func @transform_1(%arg0: i32) -> (i32, i32) {
    %c0_i32 = arith.constant 0 : i32
    %c0_i32_0 = arith.constant 0 : i32
    %c0_i32_1 = arith.constant 0 : i32
    return %c0_i32, %c0_i32_0 : i32, i32
  }
  func.func @transform_2(%arg0: i32) -> (i32, i32) {
    %c0_i32 = arith.constant 0 : i32
    %c0_i32_0 = arith.constant 0 : i32
    %c0_i32_1 = arith.constant 0 : i32
    return %c0_i32, %c0_i32_0 : i32, i32
  }
  func.func @transform_3(%arg0: i32) -> (i32, i32, i32) {
    %c0_i32 = arith.constant 0 : i32
    %c0_i32_0 = arith.constant 0 : i32
    %c0_i32_1 = arith.constant 0 : i32
    return %arg0, %c0_i32, %c0_i32_0 : i32, i32, i32
  }
}

module attributes {stable_mosaic.version = 11 : i64} {
  func.func @_attn_kernel(%arg0: i32, %arg1: memref<1x4x49xf32, #tpu.memory_space<vmem>>, %arg2: memref<1x49x2xf32, #tpu.memory_space<vmem>>, %arg3: memref<1x49x2xf32, #tpu.memory_space<vmem>>, %arg4: memref<2x4xf32, #tpu.memory_space<vmem>>, %arg5: memref<2x4xf32, #tpu.memory_space<vmem>>, %arg6: memref<1x4x49xf32, #tpu.memory_space<vmem>>) attributes {dimension_semantics = [#tpu.dimension_semantics<parallel>], iteration_bounds = array<i64: 2>, scalar_prefetch = 0 : i64, scratch_operands = 0 : i64, tpu.core_type = #tpu.core_type<tc>, window_params = [{transform_indices = @transform_0, window_bounds = array<i64: 1, 4, 49>}, {transform_indices = @transform_1, window_bounds = array<i64: 1, 49, 2>}, {transform_indices = @transform_2, window_bounds = array<i64: 1, 49, 2>}, {pipeline_mode = #tpu.pipeline_mode<synchronous>, transform_indices = @transform_3, window_bounds = array<i64: 2, 4>}, {pipeline_mode = #tpu.pipeline_mode<synchronous>, transform_indices = @transform_4, window_bounds = array<i64: 2, 4>}, {transform_indices = @transform_5, window_bounds = array<i64: 1, 4, 49>}]} {
    %c0 = arith.constant 0 : index
    %c0_0 = arith.constant 0 : index
    %0 = vector.load %arg4[%c0, %c0_0] : memref<2x4xf32, #tpu.memory_space<vmem>>, vector<2x4xf32>
    %c0_1 = arith.constant 0 : index
    %c0_2 = arith.constant 0 : index
    %1 = vector.load %arg5[%c0_1, %c0_2] : memref<2x4xf32, #tpu.memory_space<vmem>>, vector<2x4xf32>
    %c0_3 = arith.constant 0 : index
    %c0_4 = arith.constant 0 : index
    %c0_5 = arith.constant 0 : index
    %2 = vector.load %arg1[%c0_3, %c0_4, %c0_5] : memref<1x4x49xf32, #tpu.memory_space<vmem>>, vector<1x4x49xf32>
    %3 = vector.shape_cast %2 : vector<1x4x49xf32> to vector<4x49xf32>
    %cst = arith.constant dense<0.000000e+00> : vector<2x49xf32>
    %4 = tpu.matmul %0, %3, %cst {dimension_numbers = #tpu.dot_dimension_numbers<[1], [0], [0], [1], [0, 0, 1, 1], [], []>} : vector<2x4xf32>, vector<4x49xf32>, vector<2x49xf32> -> vector<2x49xf32>
    %c0_6 = arith.constant 0 : index
    %c0_7 = arith.constant 0 : index
    %c0_8 = arith.constant 0 : index
    %5 = vector.load %arg3[%c0_6, %c0_7, %c0_8] : memref<1x49x2xf32, #tpu.memory_space<vmem>>, vector<1x49x2xf32>
    %6 = vector.shape_cast %5 : vector<1x49x2xf32> to vector<49x2xf32>
    %cst_9 = arith.constant dense<0.000000e+00> : vector<49x4xf32>
    %7 = tpu.matmul %6, %1, %cst_9 {dimension_numbers = #tpu.dot_dimension_numbers<[1], [0], [0], [1], [0, 0, 1, 1], [], []>} : vector<49x2xf32>, vector<2x4xf32>, vector<49x4xf32> -> vector<49x4xf32>
    %c0_10 = arith.constant 0 : index
    %c0_11 = arith.constant 0 : index
    %c0_12 = arith.constant 0 : index
    %8 = vector.load %arg2[%c0_10, %c0_11, %c0_12] : memref<1x49x2xf32, #tpu.memory_space<vmem>>, vector<1x49x2xf32>
    %9 = vector.shape_cast %8 : vector<1x49x2xf32> to vector<49x2xf32>
    %cst_13 = arith.constant dense<0.000000e+00> : vector<49x49xf32>
    %10 = tpu.matmul %9, %4, %cst_13 {dimension_numbers = #tpu.dot_dimension_numbers<[1], [0], [0], [1], [0, 0, 1, 1], [], []>} : vector<49x2xf32>, vector<2x49xf32>, vector<49x49xf32> -> vector<49x49xf32>
    %cst_14 = arith.constant dense<0xFF800000> : vector<49xf32>
    %11 = vector.multi_reduction <maximumf>, %10, %cst_14 [0] : vector<49x49xf32> to vector<49xf32>
    %12 = vector.shape_cast %11 : vector<49xf32> to vector<1x49xf32>
    %13 = vector.broadcast %12 : vector<1x49xf32> to vector<49x49xf32>
    %14 = arith.subf %10, %13 : vector<49x49xf32>
    %15 = math.exp %14 : vector<49x49xf32>
    %cst_15 = arith.constant dense<0.000000e+00> : vector<49xf32>
    %16 = vector.multi_reduction <add>, %15, %cst_15 [0] : vector<49x49xf32> to vector<49xf32>
    %17 = vector.shape_cast %16 : vector<49xf32> to vector<1x49xf32>
    %18 = tpu.reciprocal %17 {approx = true} : vector<1x49xf32> -> vector<1x49xf32>
    %19 = vector.broadcast %18 : vector<1x49xf32> to vector<49x49xf32>
    %20 = arith.mulf %15, %19 : vector<49x49xf32>
    %cst_16 = arith.constant dense<0.000000e+00> : vector<4x49xf32>
    %21 = tpu.matmul %7, %20, %cst_16 {dimension_numbers = #tpu.dot_dimension_numbers<[0], [1], [1], [0], [0, 1, 1, 0], [], []>} : vector<49x4xf32>, vector<49x49xf32>, vector<4x49xf32> -> vector<4x49xf32>
    %c0_17 = arith.constant 0 : index
    %c0_18 = arith.constant 0 : index
    %c0_19 = arith.constant 0 : index
    %22 = vector.load %arg1[%c0_17, %c0_18, %c0_19] : memref<1x4x49xf32, #tpu.memory_space<vmem>>, vector<1x4x49xf32>
    %23 = vector.shape_cast %22 : vector<1x4x49xf32> to vector<4x49xf32>
    %24 = arith.addf %23, %21 : vector<4x49xf32>
    %c0_20 = arith.constant 0 : index
    %c0_21 = arith.constant 0 : index
    %c0_22 = arith.constant 0 : index
    %25 = vector.load %arg6[%c0_20, %c0_21, %c0_22] : memref<1x4x49xf32, #tpu.memory_space<vmem>>, vector<1x4x49xf32>
    %26 = vector.shape_cast %25 : vector<1x4x49xf32> to vector<4x49xf32>
    %27 = vector.shape_cast %24 : vector<4x49xf32> to vector<1x4x49xf32>
    tpu.vector_store %arg6[%c0_20, %c0_21, %c0_22], %27 {strides = array<i32>} : memref<1x4x49xf32, #tpu.memory_space<vmem>>, vector<1x4x49xf32>,
    return
  }
  func.func @transform_0(%arg0: i32) -> (i32, i32, i32) {
    %c0_i32 = arith.constant 0 : i32
    %c0_i32_0 = arith.constant 0 : i32
    %c0_i32_1 = arith.constant 0 : i32
    return %arg0, %c0_i32, %c0_i32_0 : i32, i32, i32
  }
  func.func @transform_1(%arg0: i32) -> (i32, i32, i32) {
    %c0_i32 = arith.constant 0 : i32
    %c0_i32_0 = arith.constant 0 : i32
    %c0_i32_1 = arith.constant 0 : i32
    return %arg0, %c0_i32, %c0_i32_0 : i32, i32, i32
  }
  func.func @transform_2(%arg0: i32) -> (i32, i32, i32) {
    %c0_i32 = arith.constant 0 : i32
    %c0_i32_0 = arith.constant 0 : i32
    %c0_i32_1 = arith.constant 0 : i32
    return %arg0, %c0_i32, %c0_i32_0 : i32, i32, i32
  }
  func.func @transform_3(%arg0: i32) -> (i32, i32) {
    %c0_i32 = arith.constant 0 : i32
    %c0_i32_0 = arith.constant 0 : i32
    %c0_i32_1 = arith.constant 0 : i32
    return %c0_i32, %c0_i32_0 : i32, i32
  }
  func.func @transform_4(%arg0: i32) -> (i32, i32) {
    %c0_i32 = arith.constant 0 : i32
    %c0_i32_0 = arith.constant 0 : i32
    %c0_i32_1 = arith.constant 0 : i32
    return %c0_i32, %c0_i32_0 : i32, i32
  }
  func.func @transform_5(%arg0: i32) -> (i32, i32, i32) {
    %c0_i32 = arith.constant 0 : i32
    %c0_i32_0 = arith.constant 0 : i32
    %c0_i32_1 = arith.constant 0 : i32
    return %arg0, %c0_i32, %c0_i32_0 : i32, i32, i32
  }
}

</mosaic_0001>

<bundles_post_ra>
// kernel: afnb_forward.2
= control target key start
LH: loop header
LB: loop body
LE: loop exit
PB: predicated region body
PF: predicated region fallthrough
CT: control target
= control target key end

     0   :  { %s449_s12 = smov 0   ;;  %s538_s0 = inlined_call_operand.vmem [shape: f32[2,4,49], index: 0, kind: input, shape index: {}]   ;;  %s539_s1 = inlined_call_operand.vmem [shape: f32[4,4], index: 1, kind: input, shape index: {}]   ;;  %s540_s2 = inlined_call_operand.vmem [shape: f32[147,49], index: 2, kind: input, shape index: {}]   ;;  %s541_s3 = inlined_call_operand.vmem [shape: f32[2,4,49], index: 3, kind: output, shape index: {}]  }
   0x1 LB: > { %s384_s13 = sadd.s32 4294967295, %s419_s12   ;;  %p388_p0 = scmp.ge.s32.totalorder %s419_s12, 1  ;;  %s419_s12 = sphi %s449_s12, %s13_s12  }
   0x2   : > { %p136_p1 = scmp.lt.s32.totalorder %s419_s12, 3 }
   0x4   : > { %p137_p2 = pnand %p388_p0, %p136_p1 }
   0x5   : > { %p158_p3 = scmp.lt.s32.totalorder (!%p137_p2), %s384_s13, 1  ;;  %s421_s20 = smov (!%p137_p2), 125  }
   0x6   : > { %140 = sbr.rel (%p137_p2) target bundleno = 616 (0x268), region = 32  ;;  %s422_s21 = smov (!%p137_p2), 127  }
   0x7   : > { %s423_s22 = smov (!%p137_p2), 126   ;;  %s424_s23 = smov (!%p137_p2), 121  }
   0x8   : > { %s425_s24 = smov (!%p137_p2), 114   ;;  %s426_s25 = smov (!%p137_p2), 107  }
   0x9   : > { %s427_s18 = smov (!%p137_p2), 49  }
   0xb   : > { %s543_s13 = smov (!%p158_p3, %s384_s13), 1  ;;  %vm172_vm0 = vcmask 1043456   ;;  %v166_v0 = vld [vmem:[%s539_s1] sm:$0xf]  ;;  %vm168_vm1 = vcmask 31744   ;;  %vm200_vm2 = vcmask 392192  }
   0xc   : > { %s389_s14 = sshll.u32 %s543_s13, 2  ;;  %vm206_vm3 = vcmask 384000   ;;  %vm212_vm4 = vcmask 375808   ;;  %vm219_vm5 = vcmask 343040   ;;  %v266_v13 = vld [vmem:[%s540_s2 + $0x78] sm:$0xff]  ;;  %v265_v14 = vld [vmem:[%s540_s2 + $0x70] sm:$0xff] }
   0xd   : > { %s161_s17 = scalar_lea.vmem %s538_s0, %s389_s14  ;;  %vm285_vm6 = vcmask 1042432   ;;  %289 = vmatpush.msra.mxu1 %v266_v13  ;;  %v269_v16 = vld [vmem:[%s540_s2 + $0x90] sm:$0x7]  ;;  %vm225_vm7 = vcmask 285696   ;;  %v264_v17 = vld [vmem:[%s540_s2 + $0x68] sm:$0xff]  ;;  %v267_v19 = vld [vmem:[%s540_s2 + $0x80] sm:$0xff] }
   0xe   : > { %v167_v1 = vld [vmem:[%s161_s17] sm:$0xf]  ;;  %393 = vmatpush.msk.msra.mxu2 %vm285_vm6, %v269_v16  ;;  %v268_v18 = vld [vmem:[%s540_s2 + $0x88] sm:$0xff]  ;;  %v262_v25 = vld [vmem:[%s540_s2 + $0x58] sm:$0xff]  ;;  %vm282_vm8 = vcmask 154624   ;;  %vm231_vm9 = vcmask 228352  }
   0xf   : > { %391 = vmatpush.msk.msra.mxu0 %vm172_vm0, %v167_v1  ;;  %290 = vmatpush.msra.mxu1 %v265_v14  ;;  %v263_v22 = vld [vmem:[%s540_s2 + $0x60] sm:$0xff]  ;;  %v261_v26 = vld [vmem:[%s540_s2 + $0x50] sm:$0xff]  ;;  %v260_v27 = vld [vmem:[%s540_s2 + $0x48] sm:$0xff]  ;;  %vm278_vm10 = vcmask 400384   ;;  %vm280_vm11 = vcmask 801792   ;;  %vm329_vm12 = vcmask 396288  }
  0x10   : > { %392 = vmatmul.msk.f32.vlgmr.msra.gmra.mxu0 %vm168_vm1, %v166_v0  ;;  %323 = vmatpush.msra.mxu2 %v268_v18  ;;  %v259_v37 = vld [vmem:[%s540_s2 + $0x40] sm:$0xff]  ;;  %v258_v38 = vld [vmem:[%s540_s2 + $0x38] sm:$0xff]  ;;  %v257_v39 = vld [vmem:[%s540_s2 + $0x30] sm:$0xff] }
  0x11   : > { %291 = vmatpush.msra.mxu1 %v264_v17  ;;  %v256_v40 = vld [vmem:[%s540_s2 + $0x28] sm:$0xff]  ;;  %v255_v41 = vld [vmem:[%s540_s2 + $0x20] sm:$0xff]  ;;  %v254_v42 = vld [vmem:[%s540_s2 + $0x18] sm:$0xff] }
  0x12   : > { %324 = vmatpush.msra.mxu2 %v267_v19  ;;  %v253_v43 = vld [vmem:[%s540_s2 + $0x10] sm:$0xff]  ;;  %v252_v44 = vld [vmem:[%s540_s2 + $0x8] sm:$0xff]  ;;  %v251_v45 = vld [vmem:[%s540_s2] sm:$0xff] }
  0x13   : > { %292 = vmatpush.msra.mxu1 %v263_v22 }
  0x15   : > { %293 = vmatpush.msra.mxu1 %v262_v25 }
  0x17   : > { %294 = vmatpush.msra.mxu1 %v261_v26 }
  0x19   : > { %295 = vmatpush.msra.mxu1 %v260_v27 }
  0x1b   : > { %296 = vmatpush.msra.mxu1 %v259_v37 }
  0x1d   : > { %297 = vmatpush.msra.mxu1 %v258_v38 }
  0x1f   : > { %298 = vmatpush.msra.mxu1 %v257_v39 }
  0x21   : > { %299 = vmatpush.msra.mxu1 %v256_v40 }
  0x23   : > { %300 = vmatpush.msra.mxu1 %v255_v41 }
  0x25   : > { %301 = vmatpush.msra.mxu1 %v254_v42 }
  0x27   : > { %302 = vmatpush.msra.mxu1 %v253_v43 }
  0x29   : > { %303 = vmatpush.msra.mxu1 %v252_v44 }
  0x2b   : > { %304 = vmatpush.msra.mxu1 %v251_v45 }
  0x8d   : > { %v193_v2 = vpop.f32.mrf.mxu0 }
  0x8e   : > { %209 = vrot.lane.b32.xlu1 %v193_v2, %s421_s20  ;;  %197 = vrot.lane.b32.xlu0 %v193_v2, %s422_s21  ;;  %s165_s20 = scalar_lea.vmem %s541_s3, %s389_s14 }
  0x96   : > { %203 = vrot.lane.b32.xlu0 %v193_v2, %s423_s22 }
 0x100   : > { %v198_v3 = vpop.permute.xlu0 %197  ;;  %v210_v6 = vpop.permute.xlu1 %209 }
 0x101   : > { %v201_v4 = vsel %vm200_vm2, %v198_v3, -1e+30  ;;  %v213_v10 = vsel %vm212_vm4, %v210_v6, -1e+30 }
 0x102   : > { %v202_v5 = vmax.f32 %v193_v2, %v201_v4 }
 0x104   : > { %246 = vrot.lane.b32.xlu1 %v202_v5, %s424_s23 }
 0x108   : > { %v204_v7 = vpop.permute.xlu0 %203 }
 0x109   : > { %v207_v8 = vsel %vm206_vm3, %v204_v7, -1e+30 }
 0x10a   : > { %v208_v9 = vmax.f32 %v202_v5, %v207_v8 }
 0x10c   : > { %235 = vrot.lane.b32.xlu2 %v208_v9, %s424_s23  ;;  %v214_v11 = vmax.f32 %v208_v9, %v213_v10 }
 0x10e   : > { %222 = vrot.lane.b32.xlu1 %v214_v11, %s425_s24  ;;  %216 = vrot.lane.b32.xlu0 %v214_v11, %s424_s23  ;;  %s428_s23 = smov 98  }
 0x114   : > { %240 = vrot.lane.b32.xlu2 %v208_v9, %s425_s24 }
 0x116   : > { %228 = vrot.lane.b32.xlu0 %v214_v11, %s426_s25 }
 0x166   : > { %v236_v12 = vpop.permute.xlu2 %235 }
 0x167   : > { %v238_v15 = vsel %vm219_vm5, %v236_v12, -1e+30 }
 0x168   : > { %v239_v20 = vmax.f32 %v208_v9, %v238_v15 }
 0x16e   : > { %v241_v21 = vpop.permute.xlu2 %240 }
 0x16f   : > { %v243_v23 = vsel %vm225_vm7, %v241_v21, -1e+30 }
 0x170   : > { %v244_v24 = vmax.f32 %v239_v20, %v243_v23 }
 0x172   : > { %271 = vrot.lane.b32.xlu1 %v244_v24, %s427_s18 }
 0x176   : > { %v247_v28 = vpop.permute.xlu1 %246 }
 0x177   : > { %v249_v29 = vsel %vm219_vm5, %v247_v28, -1e+30 }
 0x178   : > { %v250_v30 = vmax.f32 %v202_v5, %v249_v29 }
 0x17a   : > { %275 = vrot.lane.b32.xlu2 %v250_v30, %s428_s23 }
 0x180   : > { %v223_v31 = vpop.permute.xlu1 %222  ;;  %v217_v32 = vpop.permute.xlu0 %216 }
 0x181   : > { %v220_v33 = vsel %vm219_vm5, %v217_v32, -1e+30  ;;  %v226_v35 = vsel %vm225_vm7, %v223_v31, -1e+30 }
 0x182   : > { %v221_v34 = vmax.f32 %v214_v11, %v220_v33 }
 0x184   : > { %v227_v36 = vmax.f32 %v221_v34, %v226_v35 }
 0x188   : > { %v229_v47 = vpop.permute.xlu0 %228 }
 0x189   : > { %v232_v48 = vsel %vm231_vm9, %v229_v47, -1e+30 }
 0x18a   : > { %v233_v49 = vmax.f32 %v227_v36, %v232_v48 }
 0x1d4   : > { %v276_v46 = vpop.permute.xlu2 %275 }
 0x1d5   : > { %394 = vmatmul.msk.f32.vlgmr.msra.gmra.mxu2 %vm282_vm8, %v276_v46 }
 0x1e4   : > { %v272_v50 = vpop.permute.xlu1 %271 }
 0x1e5   : > { %v279_v51 = vsel %vm278_vm10, %v233_v49, %v272_v50 }
 0x1e6   : > { %v281_v52 = vsel %vm280_vm11, %v279_v51, %v276_v46 }
 0x1e7   : > { %305 = vmatmul.f32.vlgmr.msra.gmra.mxu1 %v281_v52 }
 0x258   : > { %v326_v53 = vpop.f32.mrf.mxu2 }
 0x264   : > { %v306_v54 = vpop.f32.mrf.mxu1 }
 0x265   : > { %v327_v55 = vadd.f32 %v326_v53, %v306_v54 }
 0x267   : > { %330 = vst.msk [vmem:[%s165_s20] sm:$0xf] %vm329_vm12, %v327_v55 }
 0x268 PF: > { %s13_s12 = sadd.s32 1, %s419_s12  }
 0x269   : > { %p10_p4 = scmp.ge.s32.totalorder %s13_s12, 4  }
 0x26b   :  { %12 = sbr.rel (!%p10_p4) target bundleno = 1 (0x1), region = 62 }

// kernel: afnb_forward.3
= control target key start
LH: loop header
LB: loop body
LE: loop exit
PB: predicated region body
PF: predicated region fallthrough
CT: control target
= control target key end

     0   :  { %s759_s18 = smov 0   ;;  %s840_s0 = inlined_call_operand.vmem [shape: f32[2,4,49], index: 0, kind: input, shape index: {}, may-alias: {0,5}]   ;;  %s841_s1 = inlined_call_operand.vmem [shape: f32[2,49,2], index: 1, kind: input, shape index: {}]   ;;  %s842_s2 = inlined_call_operand.vmem [shape: f32[2,49,2], index: 2, kind: input, shape index: {}]   ;;  %s843_s3 = inlined_call_operand.vmem [shape: f32[2,4], index: 3, kind: input, shape index: {}]   ;;  %s844_s4 = inlined_call_operand.vmem [shape: f32[2,4], index: 4, kind: input, shape index: {}]   ;;  %s845_s5 = inlined_call_operand.vmem [shape: f32[2,4,49], index: 5, kind: output, shape index: {}, may-alias: {0,5}]  }
   0x1 LB: > { %s656_s19 = sadd.s32 4294967295, %s727_s18   ;;  %p660_p0 = scmp.ge.s32.totalorder %s727_s18, 1  ;;  %s727_s18 = sphi %s759_s18, %s15_s18  }
   0x2   : > { %p206_p1 = scmp.lt.s32.totalorder %s727_s18, 3 }
   0x4   : > { %p207_p2 = pnand %p660_p0, %p206_p1 }
   0x5   : > { %p242_p3 = scmp.lt.s32.totalorder (!%p207_p2), %s656_s19, 1 }
   0x6   : > { %210 = sbr.rel (%p207_p2) target bundleno = 540 (0x21c), region = 40 }
   0xb   : > { %vm320_vm0 = vcmask 1041408   ;;  %v261_v0 = vld [vmem:[%s844_s4] sm:$0x3]  ;;  %s847_s19 = smov (!%p242_p3, %s656_s19), 1  ;;  %vm267_vm1 = vcmask 1043456   ;;  %vm263_vm2 = vcmask 31744  }
   0xc   : > { %667 = vmatpush.msk.msra.mxu0 %vm320_vm0, %v261_v0  ;;  %693 = vmatpush.msk.msra.mxu1 %vm320_vm0, %v261_v0  ;;  %s661_s22 = sshll.u32 %s847_s19, 2  ;;  %s695_s23 = smul.u32 56, %s847_s19  ;;  %v260_v1 = vld [vmem:[%s843_s3] sm:$0x3]  ;;  %vm298_vm3 = vcmask 15360   ;;  %vm431_vm4 = vcmask 400384  }
   0xd   : > { %s245_s26 = scalar_lea.vmem %s840_s0, %s661_s22  ;;  %vm440_vm5 = vcmask 393216   ;;  %s259_s12 = scalar_lea.vmem %s845_s5, %s661_s22  ;;  %vm577_vm6 = vcmask 396288  }
   0xe   : > { %s255_s6 = scalar_lea.vmem %s842_s2, %s695_s23  ;;  %v787_v2 = vld [vmem:[%s245_s26] sm:$0xf]  ;;  %s250_s9 = scalar_lea.vmem %s841_s1, %s695_s23 }
   0xf   : > { %665 = vmatpush.msk.msra.mxu3 %vm267_vm1, %v787_v2  ;;  %v291_v3 = vld [vmem:[%s255_s6] sm:$0xff]  ;;  %v293_v4 = vld [vmem:[%s255_s6 + $0x10] sm:$0xff]  ;;  %v292_v5 = vld [vmem:[%s255_s6 + $0x8] sm:$0xff] }
  0x10   : > { %666 = vmatmul.msk.f32.vlgmr.msra.gmra.mxu3 %vm263_vm2, %v260_v1  ;;  %668 = vmatmul.msk.f32.vlgmr.msra.gmra.mxu0 %vm298_vm3, %v291_v3  ;;  %v294_v6 = vld [vmem:[%s255_s6 + $0x18] sm:$0xff]  ;;  %v295_v7 = vld [vmem:[%s255_s6 + $0x20] sm:$0xff]  ;;  %v296_v8 = vld [vmem:[%s255_s6 + $0x28] sm:$0xff] }
  0x11   : > { %670 = vmatmul.msk.f32.vlgmr.msra.gmra.mxu1 %vm298_vm3, %v293_v4  ;;  %v297_v9 = vld [vmem:[%s255_s6 + $0x30] sm:$0x1]  ;;  %v362_v11 = vld [vmem:[%s250_s9] sm:$0xff]  ;;  %v365_v14 = vld [vmem:[%s250_s9 + $0x18] sm:$0xff] }
  0x12   : > { %v364_v10 = vld [vmem:[%s250_s9 + $0x10] sm:$0xff]  ;;  %v363_v15 = vld [vmem:[%s250_s9 + $0x8] sm:$0xff]  ;;  %v366_v18 = vld [vmem:[%s250_s9 + $0x20] sm:$0xff] }
  0x13   : > { %v367_v20 = vld [vmem:[%s250_s9 + $0x28] sm:$0xff]  ;;  %v368_v21 = vld [vmem:[%s250_s9 + $0x30] sm:$0x1] }
  0x18   : > { %669 = vmatmul.msk.f32.gmra.mxu0 %vm298_vm3, %v292_v5 }
  0x19   : > { %671 = vmatmul.msk.f32.gmra.mxu1 %vm298_vm3, %v294_v6 }
  0x21   : > { %672 = vmatmul.msk.f32.gmra.mxu1 %vm298_vm3, %v295_v7 }
  0x29   : > { %673 = vmatmul.msk.f32.gmra.mxu1 %vm298_vm3, %v296_v8 }
  0x31   : > { %674 = vmatmul.msk.f32.gmra.mxu1 %vm298_vm3, %v297_v9 }
  0x8d   : > { %v341_v13 = vpop.f32.mrf.mxu0 }
  0x8e   : > { %500 = vxpose.xlu0.b32.start [1/7] (short) (narrow) %v341_v13, 8  ;;  %v347_v17 = vpop.f32.mrf.mxu1 }
  0x93   : > { %v288_v12 = vpop.f32.mrf.mxu3 }
  0x94   : > { %675 = vmatpush.msk.msrb.mxu0 %vm320_vm0, %v288_v12  ;;  %694 = vmatpush.msk.msra.mxu2 %vm320_vm0, %v288_v12 }
  0x95   : > { %678 = vmatmul.msk.f32.vlgmr.msra.gmra.mxu2 %vm298_vm3, %v364_v10  ;;  %676 = vmatmul.msk.f32.vlgmr.msrb.gmra.mxu0 %vm298_vm3, %v362_v11  ;;  %v344_v16 = vpop.f32.mrf.mxu0 }
  0x96   : > { %501 = vxpose.xlu0.b32.cont [2/7] (short) (narrow) %v344_v16, 8  ;;  %v350_v19 = vpop.f32.mrf.mxu1 }
  0x9d   : > { %679 = vmatmul.msk.f32.gmra.mxu2 %vm298_vm3, %v365_v14  ;;  %677 = vmatmul.msk.f32.gmra.mxu0 %vm298_vm3, %v363_v15 }
  0x9e   : > { %502 = vxpose.xlu0.b32.cont [3/7] (short) (narrow) %v347_v17, 8  ;;  %v353_v22 = vpop.f32.mrf.mxu1 }
  0xa5   : > { %680 = vmatmul.msk.f32.gmra.mxu2 %vm298_vm3, %v366_v18 }
  0xa6   : > { %503 = vxpose.xlu0.b32.cont [4/7] (short) (narrow) %v350_v19, 8  ;;  %v356_v23 = vpop.f32.mrf.mxu1 }
  0xad   : > { %681 = vmatmul.msk.f32.gmra.mxu2 %vm298_vm3, %v367_v20 }
  0xae   : > { %504 = vxpose.xlu0.b32.cont [5/7] (short) (narrow) %v353_v22, 8  ;;  %v359_v24 = vpop.f32.mrf.mxu1 }
  0xb5   : > { %682 = vmatmul.msk.f32.gmra.mxu2 %vm298_vm3, %v368_v21 }
  0xb6   : > { %505 = vxpose.xlu0.b32.cont [6/7] (short) (narrow) %v356_v23, 8 }
  0xbe   : > { %506 = vxpose.xlu0.b32.end [7/7] (short) (narrow) %v359_v24, 8 }
 0x112   : > { %v410_v27 = vpop.f32.mrf.mxu0 }
 0x113   : > { %v432_v33 = vsel %vm431_vm4, %v410_v27, -inf }
 0x118   : > { %v416_v25 = vpop.f32.mrf.mxu2 }
 0x119   : > { %v434_v37 = vsel %vm431_vm4, %v416_v25, -inf }
 0x11a   : > { %v413_v30 = vpop.f32.mrf.mxu0 }
 0x11b   : > { %v433_v31 = vsel %vm431_vm4, %v413_v30, -inf }
 0x120   : > { %v419_v26 = vpop.f32.mrf.mxu2 }
 0x121   : > { %v435_v41 = vsel %vm431_vm4, %v419_v26, -inf }
 0x128   : > { %v422_v28 = vpop.f32.mrf.mxu2 }
 0x129   : > { %v436_v34 = vsel %vm431_vm4, %v422_v28, -inf }
 0x12a   : > { %v437_v39 = vmax.f32 %v432_v33, %v436_v34 }
 0x130   : > { %v425_v29 = vpop.f32.mrf.mxu2 }
 0x131   : > { %v438_v32 = vsel %vm431_vm4, %v425_v29, -inf }
 0x132   : > { %v439_v35 = vmax.f32 %v433_v31, %v438_v32 }
 0x134   : > { %v443_v42 = vmax.f32 %v437_v39, %v439_v35 }
 0x138   : > { %v428_v36 = vpop.f32.mrf.mxu2 }
 0x139   : > { %v441_v38 = vsel %vm440_vm5, %v428_v36, -inf }
 0x13a   : > { %v442_v40 = vmax.f32 %v434_v37, %v441_v38 }
 0x13c   : > { %v444_v43 = vmax.f32 %v442_v40, %v435_v41 }
 0x13e   : > { %v445_v44 = vmax.f32 %v443_v42, %v444_v43 }
 0x140   : > { %v446_v45 = vrot.slane %v445_v44, 4 }
 0x142   : > { %v447_v46 = vmax.f32 %v445_v44, %v446_v45 }
 0x144   : > { %v448_v47 = vrot.slane %v447_v46, 2 }
 0x146   : > { %v449_v48 = vmax.f32 %v447_v46, %v448_v47 }
 0x148   : > { %v450_v49 = vrot.slane %v449_v48, 1 }
 0x14a   : > { %v451_v50 = vmax.f32 %v449_v48, %v450_v49 }
 0x14c   : > { %v452_v51 = vsub.f32 %v410_v27, %v451_v50  ;;  %v453_v52 = vsub.f32 %v413_v30, %v451_v50  ;;  %v454_v53 = vsub.f32 %v416_v25, %v451_v50  ;;  %v455_v54 = vsub.f32 %v419_v26, %v451_v50 }
 0x14d   : > { %v456_v55 = vsub.f32 %v422_v28, %v451_v50  ;;  %v457_v59 = vsub.f32 %v425_v29, %v451_v50  ;;  %v458_v61 = vsub.f32 %v428_v36, %v451_v50  ;;  %v516_v36 = vpop.trf.xlu0 }
 0x14e   : > { %v459_v56 = vmul.f32 1.442695, %v452_v51  ;;  %v461_v57 = vmul.f32 1.442695, %v453_v52  ;;  %v463_v58 = vmul.f32 1.442695, %v454_v53 }
 0x14f   : > { %v465_v60 = vmul.f32 1.442695, %v455_v54  ;;  %v467_v62 = vmul.f32 1.442695, %v456_v55  ;;  %v469_v63 = vmul.f32 1.442695, %v457_v59 }
 0x150   : > { %705 = vpow2.f32 %v459_v56  ;;  %v471_v0 = vmul.f32 1.442695, %v458_v61 }
 0x151   : > { %707 = vpow2.f32 %v461_v57 }
 0x152   : > { %709 = vpow2.f32 %v463_v58 }
 0x153   : > { %711 = vpow2.f32 %v465_v60 }
 0x154   : > { %713 = vpow2.f32 %v467_v62 }
 0x155   : > { %715 = vpow2.f32 %v469_v63 }
 0x156   : > { %v706_v1 = vpop.eup %705  ;;  %717 = vpow2.f32 %v471_v0 }
 0x157   : > { %v708_v3 = vpop.eup %707  ;;  %v473_v4 = vsel %vm431_vm4, %v706_v1, 0.0 }
 0x158   : > { %v710_v5 = vpop.eup %709  ;;  %v474_v6 = vsel %vm431_vm4, %v708_v3, 0.0 }
 0x159   : > { %v712_v7 = vpop.eup %711  ;;  %v475_v8 = vadd.f32 %v474_v6, %v473_v4  ;;  %v476_v9 = vsel %vm431_vm4, %v710_v5, 0.0 }
 0x15a   : > { %v714_v10 = vpop.eup %713  ;;  %v478_v12 = vsel %vm431_vm4, %v712_v7, 0.0 }
 0x15b   : > { %v477_v11 = vadd.f32 %v476_v9, %v475_v8  ;;  %v716_v13 = vpop.eup %715  ;;  %v480_v15 = vsel %vm431_vm4, %v714_v10, 0.0 }
 0x15c   : > { %v718_v16 = vpop.eup %717  ;;  %v482_v18 = vsel %vm431_vm4, %v716_v13, 0.0 }
 0x15d   : > { %v479_v14 = vadd.f32 %v478_v12, %v477_v11  ;;  %v484_v20 = vsel %vm440_vm5, %v718_v16, 0.0 }
 0x15f   : > { %v481_v17 = vadd.f32 %v480_v15, %v479_v14 }
 0x161   : > { %v483_v19 = vadd.f32 %v482_v18, %v481_v17 }
 0x163   : > { %v485_v21 = vadd.f32 %v484_v20, %v483_v19 }
 0x165   : > { %v486_v22 = vrot.slane %v485_v21, 4 }
 0x167   : > { %v487_v23 = vadd.f32 %v486_v22, %v485_v21 }
 0x169   : > { %v488_v24 = vrot.slane %v487_v23, 2 }
 0x16b   : > { %v489_v25 = vadd.f32 %v488_v24, %v487_v23 }
 0x16d   : > { %v490_v26 = vrot.slane %v489_v25, 1 }
 0x16f   : > { %v491_v27 = vadd.f32 %v490_v26, %v489_v25 }
 0x171   : > { %719 = vrcp.f32 %v491_v27 }
 0x177   : > { %v720_v28 = vpop.eup %719 }
 0x178   : > { %v499_v29 = vmul.f32 %v720_v28, %v718_v16  ;;  %v498_v30 = vmul.f32 %v720_v28, %v716_v13  ;;  %v497_v31 = vmul.f32 %v720_v28, %v714_v10  ;;  %v496_v32 = vmul.f32 %v720_v28, %v712_v7 }
 0x179   : > { %v495_v33 = vmul.f32 %v720_v28, %v710_v5  ;;  %v494_v34 = vmul.f32 %v720_v28, %v708_v3  ;;  %v493_v35 = vmul.f32 %v720_v28, %v706_v1 }
 0x17a   : > { %683 = vmatpush.xpose.msk.msrb.mxu3 %vm431_vm4, %v499_v29 }
 0x17e   : > { %684 = vmatpush.xpose.msk.msrb.mxu3 %vm431_vm4, %v498_v30 }
 0x182   : > { %685 = vmatpush.xpose.msk.msrb.mxu3 %vm431_vm4, %v497_v31 }
 0x186   : > { %686 = vmatpush.xpose.msk.msrb.mxu3 %vm431_vm4, %v496_v32 }
 0x18a   : > { %687 = vmatpush.xpose.msk.msrb.mxu3 %vm431_vm4, %v495_v33 }
 0x18e   : > { %688 = vmatpush.xpose.msk.msrb.mxu3 %vm431_vm4, %v494_v34 }
 0x192   : > { %689 = vmatpush.xpose.msk.msrb.mxu3 %vm431_vm4, %v493_v35 }
 0x195   : > { %690 = vmatmul.msk.f32.vlgmr.msrb.gmra.mxu3 %vm431_vm4, %v516_v36 }
 0x218   : > { %v573_v37 = vpop.f32.mrf.mxu3 }
 0x219   : > { %v576_v38 = vadd.f32 %v573_v37, %v787_v2 }
 0x21b   : > { %578 = vst.msk [vmem:[%s259_s12] sm:$0xf] %vm577_vm6, %v576_v38 }
 0x21c PF: > { %s15_s18 = sadd.s32 1, %s727_s18  }
 0x21d   : > { %p12_p4 = scmp.ge.s32.totalorder %s15_s18, 4  }
 0x21f   :  { %14 = sbr.rel (!%p12_p4) target bundleno = 1 (0x1), region = 76 }

</bundles_post_ra>
